<compile_context>
chip_gen: v7x
topology: tpu7x:2x2x1
jax: 0.10.0
libtpu: 0.0.40
codegen_flags: <defaults>
</compile_context>

<pallas_src>
import jax
import jax.numpy as jnp
from jax.experimental import pallas as pl
from jax.experimental.pallas import tpu as pltpu


def _round_up(x, m):
    return ((x + m - 1) // m) * m


def _pick_tile(n_pad, target, step, min_tiles):
    """Largest multiple of `step` that divides n_pad, is <= target and yields >= min_tiles tiles."""
    limit = min(target, n_pad // min_tiles)
    best = step
    t = step
    while t <= limit:
        if n_pad % t == 0:
            best = t
        t += step
    return best


# ----------------------------------------------------------------------------
# Pallas kernel: one (row-tile i, k-tile) step of
#   Y = relu( A_packed @ XW_packed + b_eff )
# where A_packed column block k = [A_in[:, k-tile] | A_out[:, k-tile]]   (tm, 2*tk)
#   and XW_packed row  block k = [XW_in[k-tile]   ; XW_out[k-tile]]      (2*tk, d_pad)
# The output block is VMEM-resident across the k axis (index_map ignores k),
# so we accumulate straight into o_ref (no scratch).
# ----------------------------------------------------------------------------
def gcn_layer_kernel(a_ref, xw_ref, b_ref, o_ref):
    k = pl.program_id(1)

    @pl.when(k == 0)
    def _():
        o_ref[...] = jnp.zeros_like(o_ref)

    o_ref[...] += jnp.dot(a_ref[...], xw_ref[...],
                          preferred_element_type=jnp.float32)

    @pl.when(k == pl.num_programs(1) - 1)
    def _():
        o_ref[...] = jnp.maximum(o_ref[...] + b_ref[...], 0.0)


# ----------------------------------------------------------------------------
# Plain-JAX glue: GCN symmetric normalization (with self loops) for both flows.
# ----------------------------------------------------------------------------
def _gcn_norms(edge_index, num_nodes):
    src = edge_index[0]
    dst = edge_index[1]
    loops = jnp.arange(num_nodes, dtype=edge_index.dtype)
    src = jnp.concatenate([src, loops])
    dst = jnp.concatenate([dst, loops])
    w = jnp.ones(src.shape, jnp.float32)

    # flow='source_to_target' (gcn_in): degree over targets, out[dst] += norm * x[src]
    deg_in = jnp.zeros((num_nodes,), jnp.float32).at[dst].add(w)
    dinv_in = jnp.where(deg_in > 0, jax.lax.rsqrt(deg_in), 0.0)
    norm_in = dinv_in[src] * w * dinv_in[dst]

    # flow='target_to_source' (gcn_out): degree over sources, out[src] += norm * x[dst]
    deg_out = jnp.zeros((num_nodes,), jnp.float32).at[src].add(w)
    dinv_out = jnp.where(deg_out > 0, jax.lax.rsqrt(deg_out), 0.0)
    norm_out = dinv_out[src] * w * dinv_out[dst]

    return src, dst, norm_in, norm_out


def build_packed_adjacency(edge_index, num_nodes, n_pad, tk):
    """Dense (n_pad, 2*n_pad) adjacency where, for each k-tile of tk columns,
    the packed columns are [A_in columns of that tile | A_out columns of that tile].
    Built directly in the packed layout (single scatter, padding rows/cols stay zero)."""
    src, dst, norm_in, norm_out = _gcn_norms(edge_index, num_nodes)

    def pack_col(col, half):
        return (col // tk) * (2 * tk) + half * tk + (col % tk)

    adj = jnp.zeros((n_pad, 2 * n_pad), jnp.float32)
    adj = adj.at[dst, pack_col(src, 0)].add(norm_in)    # A_in[dst, src]
    adj = adj.at[src, pack_col(dst, 1)].add(norm_out)   # A_out[src, dst]
    # TODO(synk): cache this (and the packed XW layout) across calls when edge_index is static.
    return adj.astype(jnp.bfloat16)


# ----------------------------------------------------------------------------
# Wrapper: parameter folding, XW hoist, packing, padding, tiling, pallas_call.
# ----------------------------------------------------------------------------
def gcn_layer_forward(x, edge_index, params, *, tile_m=512, tile_k=1024):
    n, d_in = x.shape
    d_out = params["w_gcn_in"].shape[0]
    d_pad = _round_up(d_out, 128)            # lane-dense output columns

    # --- Fold the full linear chain before the ReLU (exact: it's all linear) ---
    w_fc_t = params["w_fc"].T                       # (2*D_out, D_out)
    w_fc1, w_fc2 = w_fc_t[:d_out], w_fc_t[d_out:]   # each (D_out, D_out)
    w_eff_in = params["w_gcn_in"].T @ w_fc1         # (D_in, D_out)
    w_eff_out = params["w_gcn_out"].T @ w_fc2       # (D_in, D_out)
    b_eff = (params["b_gcn_in"] @ w_fc1
             + params["b_gcn_out"] @ w_fc2
             + params["b_fc"])                      # (D_out,)

    # --- Node-dim padding (multiple of 128 only) and tile selection ---
    n_pad = _round_up(n, 128)
    tm = _pick_tile(n_pad, tile_m, 16, min_tiles=2)    # >=2 row tiles -> both v7x TCs busy
    tk = _pick_tile(n_pad, tile_k, 128, min_tiles=1)
    nk = n_pad // tk

    # --- Hoist the feature projection: XW computed once, in f32, by XLA ---
    w_comb = jnp.zeros((d_in, 2 * d_pad), jnp.float32)
    w_comb = w_comb.at[:, :d_out].set(w_eff_in)
    w_comb = w_comb.at[:, d_pad:d_pad + d_out].set(w_eff_out)
    x_pad = jnp.zeros((n_pad, d_in), jnp.float32).at[:n].set(x.astype(jnp.float32))
    xw = x_pad @ w_comb                                # (n_pad, 2*d_pad) f32

    # Pack XW to match the packed adjacency layout: per k-tile, [XW_in_k ; XW_out_k].
    xw_in = xw[:, :d_pad].reshape(nk, tk, d_pad)
    xw_out = xw[:, d_pad:].reshape(nk, tk, d_pad)
    xw_packed = jnp.concatenate([xw_in, xw_out], axis=1).reshape(2 * n_pad, d_pad)
    xw_packed = xw_packed.astype(jnp.bfloat16)         # single rounding to bf16

    a_packed = build_packed_adjacency(edge_index, n, n_pad, tk)   # (n_pad, 2*n_pad) bf16
    b_pad = jnp.zeros((1, d_pad), jnp.float32).at[:, :d_out].set(b_eff)

    grid = (n_pad // tm, n_pad // tk)

    out = pl.pallas_call(
        gcn_layer_kernel,
        out_shape=jax.ShapeDtypeStruct((n_pad, d_pad), jnp.float32),
        grid_spec=pltpu.PrefetchScalarGridSpec(
            num_scalar_prefetch=0,
            grid=grid,
            in_specs=[
                pl.BlockSpec((tm, 2 * tk), lambda i, k: (i, k)),      # packed A tile
                pl.BlockSpec((2 * tk, d_pad), lambda i, k: (k, 0)),   # packed XW tile
                pl.BlockSpec((1, d_pad), lambda i, k: (0, 0)),        # folded bias
            ],
            out_specs=pl.BlockSpec((tm, d_pad), lambda i, k: (i, 0)),
        ),
        compiler_params=pltpu.CompilerParams(
            dimension_semantics=("parallel", "arbitrary"),
            vmem_limit_bytes=48 * 1024 * 1024),        # sized against v7x's 64 MiB VMEM
    )(a_packed, xw_packed, b_pad)

    return out[:n, :d_out]


# ----------------------------------------------------------------------------
# Pure-JAX f32 reference (unfused, same math) for a correctness check.
# ----------------------------------------------------------------------------
def gcn_layer_reference(x, edge_index, params):
    n = x.shape[0]
    src, dst, norm_in, norm_out = _gcn_norms(edge_index, n)
    a_in = jnp.zeros((n, n), jnp.float32).at[dst, src].add(norm_in)
    a_out = jnp.zeros((n, n), jnp.float32).at[src, dst].add(norm_out)
    h_in = a_in @ (x @ params["w_gcn_in"].T) + params["b_gcn_in"]
    h_out = a_out @ (x @ params["w_gcn_out"].T) + params["b_gcn_out"]
    pot = jnp.concatenate([h_in, h_out], axis=1)
    return jnp.maximum(pot @ params["w_fc"].T + params["b_fc"], 0.0)


if __name__ == "__main__":
    NUM_NODES = 16
    NUM_EDGES = 24
    INPUT_DIM = 8
    OUTPUT_DIM = 32

    key = jax.random.PRNGKey(0)
    kx, ke, k1, k2, k3, k4, k5, k6 = jax.random.split(key, 8)

    x = jax.random.normal(kx, (NUM_NODES, INPUT_DIM), dtype=jnp.float32)
    edge_index = jax.random.randint(ke, (2, NUM_EDGES), 0, NUM_NODES, dtype=jnp.int32)

    params = {
        "w_gcn_in": 0.1 * jax.random.normal(k1, (OUTPUT_DIM, INPUT_DIM), jnp.float32),
        "b_gcn_in": 0.1 * jax.random.normal(k2, (OUTPUT_DIM,), jnp.float32),
        "w_gcn_out": 0.1 * jax.random.normal(k3, (OUTPUT_DIM, INPUT_DIM), jnp.float32),
        "b_gcn_out": 0.1 * jax.random.normal(k4, (OUTPUT_DIM,), jnp.float32),
        "w_fc": 0.1 * jax.random.normal(k5, (OUTPUT_DIM, 2 * OUTPUT_DIM), jnp.float32),
        "b_fc": 0.1 * jax.random.normal(k6, (OUTPUT_DIM,), jnp.float32),
    }

    fwd = jax.jit(gcn_layer_forward)       # adjacency build + XW hoist + kernel in one jit
    out = jax.block_until_ready(fwd(x, edge_index, params))

    ref = jax.block_until_ready(gcn_layer_reference(x, edge_index, params))
    assert out.shape == (NUM_NODES, OUTPUT_DIM)
    # bf16 adjacency / bf16 XW (single rounding) + folded-weight reassociation.
    assert jnp.allclose(out, ref, atol=3e-2, rtol=3e-2)

    print("KERNEL_OK")
</pallas_src>

<mosaic_0001>
module attributes {stable_mosaic.version = 11 : i64} {
  func.func @gcn_layer_kernel(%arg0: i32, %arg1: i32, %arg2: memref<64x256xbf16, #tpu.memory_space<vmem>>, %arg3: memref<256x128xbf16, #tpu.memory_space<vmem>>, %arg4: memref<1x128xf32, #tpu.memory_space<vmem>>, %arg5: memref<64x128xf32, #tpu.memory_space<vmem>>) attributes {dimension_semantics = [#tpu.dimension_semantics<parallel>, #tpu.dimension_semantics<arbitrary>], iteration_bounds = array<i64: 2, 1>, scalar_prefetch = 0 : i64, scratch_operands = 0 : i64, tpu.core_type = #tpu.core_type<tc>, window_params = [{transform_indices = @transform_0, window_bounds = array<i64: 64, 256>}, {transform_indices = @transform_1, window_bounds = array<i64: 256, 128>}, {pipeline_mode = #tpu.pipeline_mode<synchronous>, transform_indices = @transform_2, window_bounds = array<i64: 1, 128>}, {transform_indices = @transform_3, window_bounds = array<i64: 64, 128>}]} {
    %c0_i32 = arith.constant 0 : i32
    %0 = arith.cmpi eq, %arg1, %c0_i32 : i32
    %1 = arith.extui %0 : i1 to i32
    %c0_i32_0 = arith.constant 0 : i32
    %2 = arith.cmpi ne, %1, %c0_i32_0 : i32
    scf.if %2 {
      %cst_10 = arith.constant 0.000000e+00 : f32
      %12 = vector.broadcast %cst_10 : f32 to vector<64x128xf32>
      %c0_11 = arith.constant 0 : index
      %c0_12 = arith.constant 0 : index
      %13 = vector.load %arg5[%c0_11, %c0_12] : memref<64x128xf32, #tpu.memory_space<vmem>>, vector<64x128xf32>
      tpu.vector_store %arg5[%c0_11, %c0_12], %12 {strides = array<i32>} : memref<64x128xf32, #tpu.memory_space<vmem>>, vector<64x128xf32>,
    } else {
    }
    %c0 = arith.constant 0 : index
    %c0_1 = arith.constant 0 : index
    %3 = vector.load %arg5[%c0, %c0_1] : memref<64x128xf32, #tpu.memory_space<vmem>>, vector<64x128xf32>
    %c0_2 = arith.constant 0 : index
    %c0_3 = arith.constant 0 : index
    %4 = vector.load %arg2[%c0_2, %c0_3] : memref<64x256xbf16, #tpu.memory_space<vmem>>, vector<64x256xbf16>
    %c0_4 = arith.constant 0 : index
    %c0_5 = arith.constant 0 : index
    %5 = vector.load %arg3[%c0_4, %c0_5] : memref<256x128xbf16, #tpu.memory_space<vmem>>, vector<256x128xbf16>
    %cst = arith.constant dense<0.000000e+00> : vector<64x128xf32>
    %6 = tpu.matmul %4, %5, %cst {dimension_numbers = #tpu.dot_dimension_numbers<[1], [0], [0], [1], [0, 0, 1, 1], [], []>} : vector<64x256xbf16>, vector<256x128xbf16>, vector<64x128xf32> -> vector<64x128xf32>
    %7 = arith.addf %3, %6 : vector<64x128xf32>
    %c0_6 = arith.constant 0 : index
    %c0_7 = arith.constant 0 : index
    %8 = vector.load %arg5[%c0_6, %c0_7] : memref<64x128xf32, #tpu.memory_space<vmem>>, vector<64x128xf32>
    tpu.vector_store %arg5[%c0_6, %c0_7], %7 {strides = array<i32>} : memref<64x128xf32, #tpu.memory_space<vmem>>, vector<64x128xf32>,
    %c0_i32_8 = arith.constant 0 : i32
    %9 = arith.cmpi eq, %arg1, %c0_i32_8 : i32
    %10 = arith.extui %9 : i1 to i32
    %c0_i32_9 = arith.constant 0 : i32
    %11 = arith.cmpi ne, %10, %c0_i32_9 : i32
    scf.if %11 {
      %c0_10 = arith.constant 0 : index
      %c0_11 = arith.constant 0 : index
      %12 = vector.load %arg5[%c0_10, %c0_11] : memref<64x128xf32, #tpu.memory_space<vmem>>, vector<64x128xf32>
      %c0_12 = arith.constant 0 : index
      %c0_13 = arith.constant 0 : index
      %13 = vector.load %arg4[%c0_12, %c0_13] : memref<1x128xf32, #tpu.memory_space<vmem>>, vector<1x128xf32>
      %14 = vector.broadcast %13 : vector<1x128xf32> to vector<64x128xf32>
      %15 = arith.addf %12, %14 : vector<64x128xf32>
      %cst_14 = arith.constant 0.000000e+00 : f32
      %16 = vector.broadcast %cst_14 : f32 to vector<64x128xf32>
      %17 = arith.maximumf %15, %16 : vector<64x128xf32>
      %c0_15 = arith.constant 0 : index
      %c0_16 = arith.constant 0 : index
      %18 = vector.load %arg5[%c0_15, %c0_16] : memref<64x128xf32, #tpu.memory_space<vmem>>, vector<64x128xf32>
      tpu.vector_store %arg5[%c0_15, %c0_16], %17 {strides = array<i32>} : memref<64x128xf32, #tpu.memory_space<vmem>>, vector<64x128xf32>,
    } else {
    }
    return
  }
  func.func @transform_0(%arg0: i32, %arg1: i32) -> (i32, i32) {
    %c0_i32 = arith.constant 0 : i32
    return %arg0, %arg1 : i32, i32
  }
  func.func @transform_1(%arg0: i32, %arg1: i32) -> (i32, i32) {
    %c0_i32 = arith.constant 0 : i32
    %c0_i32_0 = arith.constant 0 : i32
    return %arg1, %c0_i32 : i32, i32
  }
  func.func @transform_2(%arg0: i32, %arg1: i32) -> (i32, i32) {
    %c0_i32 = arith.constant 0 : i32
    %c0_i32_0 = arith.constant 0 : i32
    %c0_i32_1 = arith.constant 0 : i32
    return %c0_i32, %c0_i32_0 : i32, i32
  }
  func.func @transform_3(%arg0: i32, %arg1: i32) -> (i32, i32) {
    %c0_i32 = arith.constant 0 : i32
    %c0_i32_0 = arith.constant 0 : i32
    return %arg0, %c0_i32 : i32, i32
  }
}

</mosaic_0001>

<bundles_post_ra>
// kernel: mul.4
= control target key start
LH: loop header
LB: loop body
LE: loop exit
PB: predicated region body
PF: predicated region fallthrough
CT: control target
= control target key end

     0   :  { %s34_s0 = inlined_call_operand.vmem [shape: f32[40], index: 0, kind: input, shape index: {}]   ;;  %s35_s1 = inlined_call_operand.vmem [shape: f32[40], index: 1, kind: input, shape index: {}]   ;;  %s36_s2 = inlined_call_operand.vmem [shape: f32[40], index: 2, kind: output, shape index: {}]  }
   0x1   :  { %v3_v0 = vld [vmem:[%s34_s0] sm:$0x1] }
   0x2   :  { %v4_v1 = vld [vmem:[%s35_s1] sm:$0x1] }
   0x3   :  { %v7_v2 = vmul.f32 %v4_v1, %v3_v0 }
   0x5   :  { %9 = vst [vmem:[%s36_s2] sm:$0x1] %v7_v2 }

// kernel: gcn_layer_forward.1
= control target key start
LH: loop header
LB: loop body
LE: loop exit
PB: predicated region body
PF: predicated region fallthrough
CT: control target
= control target key end

     0   :  { %s825_s12 = smov 0   ;;  %s827_s13 = smov 0   ;;  %s936_s0 = inlined_call_operand.vmem [shape: bf16[128,256], index: 0, kind: input, shape index: {}]   ;;  %s937_s1 = inlined_call_operand.vmem [shape: bf16[256,128], index: 1, kind: input, shape index: {}]   ;;  %s938_s2 = inlined_call_operand.vmem [shape: f32[1,128], index: 2, kind: input, shape index: {}]   ;;  %s939_s3 = inlined_call_operand.vmem [shape: f32[128,128], index: 3, kind: output, shape index: {}]  }
   0x1   :  { %s829_s14 = smov 0  }
   0x2 LB: > { %s25_s15 = sadd.s32 1, %s799_s13  ;;  %p638_p0 = scmp.ge.s32.totalorder %s803_s14, 1  ;;  %s803_s14 = sphi %s829_s14, %s13_s14   ;;  %s799_s13 = sphi %s827_s13, %s941_s13   ;;  %s795_s12 = sphi %s825_s12, %s940_s12  }
   0x3   : > { %p27_p1 = scmp.ge.s32.totalorder %s25_s15, 2  ;;  %p169_p2 = scmp.lt.s32.totalorder %s803_s14, 3 }
   0x5   : > { %s943_s15 = smov (%p27_p1, %s25_s15), 0  ;;  %p170_p3 = pnand %p638_p0, %p169_p2 }
   0x6   : > { %v753_v0 = vld [vmem:[%s937_s1 + $0x40] sm:$0xff] (!%p170_p3)   ;;  %s639_s18 = sshll.u32 (!%p170_p3), %s795_s12, 3  ;;  %v755_v2 = vld [vmem:[%s937_s1 + $0x48] sm:$0xff] (!%p170_p3)   ;;  %v757_v4 = vld [vmem:[%s937_s1 + $0x50] sm:$0xff] (!%p170_p3)  }
   0x7   : > { %173 = sbr.rel (%p170_p3) target bundleno = 269 (0x10d), region = 32  ;;  %v754_v1 = vld [vmem:[%s937_s1] sm:$0xff] (!%p170_p3)   ;;  %672 = vmatprep.subr.bf16.mxu0 (!%p170_p3), %v753_v0  ;;  %712 = vmatprep.subr.bf16.mxu1 (!%p170_p3), %v753_v0  ;;  %v756_v3 = vld [vmem:[%s937_s1 + $0x8] sm:$0xff] (!%p170_p3)   ;;  %p205_p4 = scmp.lt.s32.totalorder (!%p170_p3), %s639_s18, 15  ;;  %v758_v5 = vld [vmem:[%s937_s1 + $0x10] sm:$0xff] (!%p170_p3)  }
   0x8   : > { %673 = vmatpush3.bf16.msra.mxu0 (!%p170_p3), %v754_v1  ;;  %720 = vmatpush3.bf16.msra.mxu1 (!%p170_p3), %v754_v1  ;;  %v759_v6 = vld [vmem:[%s937_s1 + $0x58] sm:$0xff] (!%p170_p3)   ;;  %v761_v8 = vld [vmem:[%s937_s1 + $0x60] sm:$0xff] (!%p170_p3)   ;;  %v763_v10 = vld [vmem:[%s937_s1 + $0x68] sm:$0xff] (!%p170_p3)  }
   0x9   : > { %674 = vmatprep.subr.bf16.mxu0 (!%p170_p3), %v755_v2  ;;  %713 = vmatprep.subr.bf16.mxu1 (!%p170_p3), %v755_v2  ;;  %v760_v7 = vld [vmem:[%s937_s1 + $0x18] sm:$0xff] (!%p170_p3)   ;;  %v762_v9 = vld [vmem:[%s937_s1 + $0x20] sm:$0xff] (!%p170_p3)   ;;  %v764_v13 = vld [vmem:[%s937_s1 + $0x28] sm:$0xff] (!%p170_p3)  }
   0xa   : > { %v765_v14 = vld [vmem:[%s937_s1 + $0x70] sm:$0xff] (!%p170_p3)   ;;  %v767_v16 = vld [vmem:[%s937_s1 + $0x78] sm:$0xff] (!%p170_p3)   ;;  %v668_v32 = vld [vmem:[%s938_s2] ss:$0 sm:$0xff] (!%p170_p3) }
   0xb   : > { %v766_v15 = vld [vmem:[%s937_s1 + $0x30] sm:$0xff] (!%p170_p3)   ;;  %v768_v17 = vld [vmem:[%s937_s1 + $0x38] sm:$0xff] (!%p170_p3)  }
   0xc   : > { %675 = vmatpush3.bf16.msra.mxu0 (!%p170_p3), %v756_v3  ;;  %721 = vmatpush3.bf16.msra.mxu1 (!%p170_p3), %v756_v3 }
   0xd   : > { %676 = vmatprep.subr.bf16.mxu0 (!%p170_p3), %v757_v4  ;;  %714 = vmatprep.subr.bf16.mxu1 (!%p170_p3), %v757_v4 }
   0xe   : > { %s945_s18 = smov (!%p205_p4, %s639_s18), 15 }
   0xf   : > { %s671_s6 = sshll.u32 %s945_s18, 3 }
  0x10   : > { %677 = vmatpush3.bf16.msra.mxu0 %v758_v5  ;;  %722 = vmatpush3.bf16.msra.mxu1 %v758_v5  ;;  %s878_s11 = scalar_lea.vmem %s936_s0, %s671_s6  ;;  %s917_s8 = scalar_lea.vmem %s939_s3, %s671_s6 }
  0x11   : > { %678 = vmatprep.subr.bf16.mxu0 %v759_v6  ;;  %715 = vmatprep.subr.bf16.mxu1 %v759_v6  ;;  %v771_v11 = vld [vmem:[%s878_s11 + $0x4] ss:$8 sps:$4 sm:$0xff]   ;;  %v769_v18 = vld [vmem:[%s878_s11] ss:$8 sps:$4 sm:$0xff]   ;;  %v775_v20 = vld [vmem:[%s878_s11 + $0x14] ss:$8 sps:$4 sm:$0xff]  }
  0x12   : > { %v774_v12 = vld [vmem:[%s878_s11 + $0x24] ss:$8 sps:$4 sm:$0xff]   ;;  %456 = vmatprep.mubr.bf16.mxu0 %v771_v11  ;;  %v772_v19 = vld [vmem:[%s878_s11 + $0x20] ss:$8 sps:$4 sm:$0xff]   ;;  %v777_v21 = vld [vmem:[%s878_s11 + $0x34] ss:$8 sps:$4 sm:$0xff]  }
  0x13   : > { %472 = vmatprep.mubr.bf16.mxu1 %v774_v12  ;;  %v779_v22 = vld [vmem:[%s878_s11 + $0x10] ss:$8 sps:$4 sm:$0xff]  }
  0x14   : > { %679 = vmatpush3.bf16.msra.mxu0 %v760_v7  ;;  %723 = vmatpush3.bf16.msra.mxu1 %v760_v7  ;;  %v780_v23 = vld [vmem:[%s878_s11 + $0x30] ss:$8 sps:$4 sm:$0xff]  }
  0x15   : > { %680 = vmatprep.subr.bf16.mxu0 %v761_v8  ;;  %716 = vmatprep.subr.bf16.mxu1 %v761_v8 }
  0x18   : > { %681 = vmatpush3.bf16.msra.mxu0 %v762_v9  ;;  %724 = vmatpush3.bf16.msra.mxu1 %v762_v9 }
  0x19   : > { %682 = vmatprep.subr.bf16.mxu0 %v763_v10  ;;  %717 = vmatprep.subr.bf16.mxu1 %v763_v10 }
  0x1c   : > { %683 = vmatpush3.bf16.msra.mxu0 %v764_v13  ;;  %725 = vmatpush3.bf16.msra.mxu1 %v764_v13 }
  0x1d   : > { %684 = vmatprep.subr.bf16.mxu0 %v765_v14  ;;  %718 = vmatprep.subr.bf16.mxu1 %v765_v14 }
  0x20   : > { %685 = vmatpush3.bf16.msra.mxu0 %v766_v15  ;;  %726 = vmatpush3.bf16.msra.mxu1 %v766_v15 }
  0x21   : > { %686 = vmatprep.subr.bf16.mxu0 %v767_v16  ;;  %719 = vmatprep.subr.bf16.mxu1 %v767_v16 }
  0x24   : > { %687 = vmatpush3.bf16.msra.mxu0 %v768_v17  ;;  %727 = vmatpush3.bf16.msra.mxu1 %v768_v17 }
  0x27   : > { %457 = vmatmul.mubr.bf16.vlgmr.msra.gmra.mrb[0].mxu0 %v769_v18  ;;  %473 = vmatmul.mubr.bf16.vlgmr.msra.gmra.mrb[0].mxu1 %v772_v19 }
  0x28   : > { %464 = vmatprep.mubr.bf16.mxu0 %v775_v20  ;;  %480 = vmatprep.mubr.bf16.mxu1 %v777_v21 }
  0x2f   : > { %465 = vmatmul.mubr.bf16.gmra.mrb[4].mxu0 %v779_v22  ;;  %481 = vmatmul.mubr.bf16.gmra.mrb[4].mxu1 %v780_v23 }
  0xfa   : > { %v688_v24 = vpop.f32.mrb[0].mxu0  ;;  %v700_v25 = vpop.f32.mrb[0].mxu1 }
  0xfb   : > { %v689_v26 = vpop.f32.mrb[1].mxu0  ;;  %v701_v27 = vpop.f32.mrb[1].mxu1 }
  0xfc   : > { %v690_v28 = vadd.f32 %v689_v26, %v688_v24  ;;  %v702_v29 = vadd.f32 %v701_v27, %v700_v25  ;;  %v691_v30 = vpop.f32.mrb[2].mxu0  ;;  %v703_v31 = vpop.f32.mrb[2].mxu1 }
  0xfd   : > { %v692_v33 = vpop.f32.mrb[3].mxu0  ;;  %v704_v34 = vpop.f32.mrb[3].mxu1 }
  0xfe   : > { %v693_v35 = vadd.f32 %v692_v33, %v691_v30  ;;  %v705_v36 = vadd.f32 %v704_v34, %v703_v31  ;;  %v523_v37 = vadd.f32 %v690_v28, %v668_v32  ;;  %v527_v38 = vadd.f32 %v702_v29, %v668_v32 }
 0x100   : > { %v531_v39 = vmax.f32 %v523_v37, 0.0  ;;  %v535_v40 = vmax.f32 %v527_v38, 0.0  ;;  %v524_v41 = vadd.f32 %v693_v35, %v668_v32  ;;  %v528_v42 = vadd.f32 %v705_v36, %v668_v32 }
 0x102   : > { %v694_v43 = vpop.f32.mrb[4].mxu0  ;;  %v706_v44 = vpop.f32.mrb[4].mxu1  ;;  %539 = vst [vmem:[%s917_s8] sm:$0xff] %v531_v39  ;;  %543 = vst [vmem:[%s917_s8 + $0x20] sm:$0xff] %v535_v40  ;;  %v532_v47 = vmax.f32 %v524_v41, 0.0  ;;  %v536_v48 = vmax.f32 %v528_v42, 0.0 }
 0x103   : > { %v695_v45 = vpop.f32.mrb[5].mxu0  ;;  %v707_v46 = vpop.f32.mrb[5].mxu1 }
 0x104   : > { %v696_v49 = vadd.f32 %v695_v45, %v694_v43  ;;  %v708_v50 = vadd.f32 %v707_v46, %v706_v44  ;;  %v697_v51 = vpop.f32.mrb[6].mxu0  ;;  %v709_v52 = vpop.f32.mrb[6].mxu1  ;;  %540 = vst [vmem:[%s917_s8 + $0x8] sm:$0xff] %v532_v47  ;;  %544 = vst [vmem:[%s917_s8 + $0x28] sm:$0xff] %v536_v48 }
 0x105   : > { %v698_v53 = vpop.f32.mrb[7].mxu0  ;;  %v710_v54 = vpop.f32.mrb[7].mxu1 }
 0x106   : > { %v699_v55 = vadd.f32 %v698_v53, %v697_v51  ;;  %v711_v56 = vadd.f32 %v710_v54, %v709_v52  ;;  %v525_v57 = vadd.f32 %v696_v49, %v668_v32  ;;  %v529_v58 = vadd.f32 %v708_v50, %v668_v32 }
 0x108   : > { %v533_v59 = vmax.f32 %v525_v57, 0.0  ;;  %v537_v60 = vmax.f32 %v529_v58, 0.0  ;;  %v526_v61 = vadd.f32 %v699_v55, %v668_v32  ;;  %v530_v62 = vadd.f32 %v711_v56, %v668_v32 }
 0x10a   : > { %541 = vst [vmem:[%s917_s8 + $0x10] sm:$0xff] %v533_v59  ;;  %545 = vst [vmem:[%s917_s8 + $0x30] sm:$0xff] %v537_v60  ;;  %v534_v63 = vmax.f32 %v526_v61, 0.0  ;;  %v538_v0 = vmax.f32 %v530_v62, 0.0 }
 0x10c   : > { %542 = vst [vmem:[%s917_s8 + $0x18] sm:$0xff] %v534_v63  ;;  %546 = vst [vmem:[%s917_s8 + $0x38] sm:$0xff] %v538_v0 }
 0x10d PF: > { %s13_s14 = sadd.s32 1, %s803_s14   ;;  %s940_s12 = smov %s799_s13 }
 0x10e   : > { %p10_p5 = scmp.ge.s32.totalorder %s13_s14, 4   ;;  %s941_s13 = smov %s943_s15 }
 0x110   :  { %12 = sbr.rel (!%p10_p5) target bundleno = 2 (0x2), region = 73 }

</bundles_post_ra>
